<compile_context>
chip_gen: v5e
topology: v5e:2x2
jax: 0.10.0
libtpu: 0.0.40
codegen_flags: <defaults>
</compile_context>

<pallas_src>
import jax
import jax.numpy as jnp
from jax.experimental import pallas as pl
from jax.experimental.pallas import tpu as pltpu


LANE = 128  # pad hidden and class dims up to one full vreg lane width


def _round_up(n, m):
    return ((n + m - 1) // m) * m


def pack_params(w1, b1, gamma, beta, w2, b2):
    """One-time parameter prep: pad to lane-dense 128 and pack into a single
    contiguous f32 buffer.  Layout (rows x 128 lanes):
        [0, D)        : w1  (padded cols -> 0)
        D             : b1
        D+1           : gamma   (padded cols 0 => padded features stay 0)
        D+2           : beta
        D+3           : b2
        [w2_off, +128): w2  (padded rows/cols -> 0), w2_off 8-aligned
    """
    D, H = w1.shape
    Hc, C = w2.shape
    assert Hc == H and H <= LANE and C <= LANE
    w2_off = _round_up(D + 4, 8)
    rows = w2_off + LANE

    p = jnp.zeros((rows, LANE), jnp.float32)
    p = p.at[0:D, :H].set(w1.astype(jnp.float32))
    p = p.at[D, :H].set(jnp.ravel(b1).astype(jnp.float32))
    p = p.at[D + 1, :H].set(jnp.ravel(gamma).astype(jnp.float32))
    p = p.at[D + 2, :H].set(jnp.ravel(beta).astype(jnp.float32))
    p = p.at[D + 3, :C].set(jnp.ravel(b2).astype(jnp.float32))
    p = p.at[w2_off:w2_off + H, :C].set(w2.astype(jnp.float32))
    return p


def classifier_head_kernel(x_ref, p_ref, out_ref):
    D = x_ref.shape[1]
    w2_off = p_ref.shape[0] - LANE  # 8-aligned by construction

    # Static slices of the packed parameter buffer (zero runtime cost).
    w1 = p_ref[0:D, :]                         # [D, 128]
    b1 = p_ref[D:D + 1, :]                     # [1, 128]
    gamma = p_ref[D + 1:D + 2, :]              # [1, 128]
    beta = p_ref[D + 2:D + 3, :]               # [1, 128]
    b2 = p_ref[D + 3:D + 4, :]                 # [1, 128]
    w2 = p_ref[w2_off:w2_off + LANE, :]        # [128, 128]

    # ---- fc1: [B, D] @ [D, 128] + b1 ----
    h = jnp.dot(x_ref[...], w1, preferred_element_type=jnp.float32) + b1

    # ---- BatchNorm1d (training mode: batch stats, biased variance),
    #      folded into a per-feature scale/shift ----
    eps = 1e-5
    inv_b = 1.0 / h.shape[0]
    mean = jnp.sum(h, axis=0, keepdims=True) * inv_b        # [1, 128]
    centered = h - mean                                      # reused once
    var = jnp.sum(centered * centered, axis=0, keepdims=True) * inv_b
    scale = gamma * jax.lax.rsqrt(var + eps)                 # [1, 128]
    shift = beta - mean * scale                              # [1, 128]

    # ---- BN-apply + ReLU (mul + add + max per element) ----
    h = jnp.maximum(h * scale + shift, 0.0)

    # ---- fc2: [B, 128] @ [128, 128] + b2  (lane-dense 128-wide store) ----
    out_ref[...] = jnp.dot(h, w2, preferred_element_type=jnp.float32) + b2


def classifier_head(x, packed_params, class_num):
    """x: [B, D] f32, packed_params from pack_params -> logits [B, class_num]."""
    B, D = x.shape

    cost = pl.CostEstimate(
        flops=2 * B * (D * LANE + LANE * LANE),
        transcendentals=LANE,                     # rsqrt over padded hidden dim
        bytes_accessed=4 * (x.size + packed_params.size + B * LANE),
    )

    vmem = pl.BlockSpec(memory_space=pltpu.MemorySpace.VMEM)
    logits_padded = pl.pallas_call(
        classifier_head_kernel,
        out_shape=jax.ShapeDtypeStruct((B, LANE), jnp.float32),
        in_specs=[vmem, vmem],
        out_specs=vmem,
        cost_estimate=cost,
    )(x, packed_params)

    # TODO(synk): padded logit columns are 0.0 (not -inf); if this slice is
    # removed for perf the consumer (softmax/argmax) must mask columns >= C.
    return logits_padded[:, :class_num]


def reference(x, w1, b1, gamma, beta, w2, b2):
    h = x @ w1 + b1
    mean = jnp.mean(h, axis=0, keepdims=True)
    var = jnp.mean((h - mean) ** 2, axis=0, keepdims=True)
    h = (h - mean) / jnp.sqrt(var + 1e-5) * gamma + beta
    h = jnp.maximum(h, 0.0)
    return h @ w2 + b2


if __name__ == "__main__":
    # Small shapes consistent with the module: batch=8, in_feature_dim=32,
    # hidden_dim=64, class_num=31.
    B, D_IN, HIDDEN, CLASSES = 8, 32, 64, 31

    key = jax.random.PRNGKey(0)
    kx, k1, k2, k3, k4, k5, k6 = jax.random.split(key, 7)

    x = jax.random.normal(kx, (B, D_IN), dtype=jnp.float32)

    # Deterministic parameter init (synthetic; shapes match nn.Linear / nn.BatchNorm1d).
    w1 = jax.random.normal(k1, (D_IN, HIDDEN), dtype=jnp.float32) * (1.0 / jnp.sqrt(D_IN))
    b1 = jax.random.normal(k2, (1, HIDDEN), dtype=jnp.float32) * 0.01
    gamma = 1.0 + 0.1 * jax.random.normal(k3, (1, HIDDEN), dtype=jnp.float32)
    beta = 0.1 * jax.random.normal(k4, (1, HIDDEN), dtype=jnp.float32)
    w2 = jax.random.normal(k5, (HIDDEN, CLASSES), dtype=jnp.float32) * (1.0 / jnp.sqrt(HIDDEN))
    b2 = jax.random.normal(k6, (1, CLASSES), dtype=jnp.float32) * 0.01

    # One-time parameter packing/padding (init-side, NOT in the per-call path).
    packed = jax.block_until_ready(pack_params(w1, b1, gamma, beta, w2, b2))

    head = jax.jit(classifier_head, static_argnums=2)
    logits = head(x, packed, CLASSES)
    jax.block_until_ready(logits)

    ref = reference(x, w1, b1, gamma, beta, w2, b2)
    assert logits.shape == (B, CLASSES)
    assert jnp.allclose(logits, ref, atol=1e-4, rtol=1e-4), "mismatch vs reference"

    print("KERNEL_OK")
</pallas_src>

<mosaic_0001>
module attributes {stable_mosaic.version = 11 : i64} {
  func.func @classifier_head_kernel(%arg0: memref<8x32xf32, #tpu.memory_space<vmem>>, %arg1: memref<168x128xf32, #tpu.memory_space<vmem>>, %arg2: memref<8x128xf32, #tpu.memory_space<vmem>>) attributes {dimension_semantics = [], scalar_prefetch = 0 : i64, scratch_operands = 0 : i64, tpu.core_type = #tpu.core_type<tc>} {
    %c0 = arith.constant 0 : index
    %c0_0 = arith.constant 0 : index
    %0 = vector.load %arg1[%c0, %c0_0] : memref<168x128xf32, #tpu.memory_space<vmem>>, vector<32x128xf32>
    %c32 = arith.constant 32 : index
    %c0_1 = arith.constant 0 : index
    %1 = vector.load %arg1[%c32, %c0_1] : memref<168x128xf32, #tpu.memory_space<vmem>>, vector<1x128xf32>
    %c33 = arith.constant 33 : index
    %c0_2 = arith.constant 0 : index
    %2 = vector.load %arg1[%c33, %c0_2] : memref<168x128xf32, #tpu.memory_space<vmem>>, vector<1x128xf32>
    %c34 = arith.constant 34 : index
    %c0_3 = arith.constant 0 : index
    %3 = vector.load %arg1[%c34, %c0_3] : memref<168x128xf32, #tpu.memory_space<vmem>>, vector<1x128xf32>
    %c35 = arith.constant 35 : index
    %c0_4 = arith.constant 0 : index
    %4 = vector.load %arg1[%c35, %c0_4] : memref<168x128xf32, #tpu.memory_space<vmem>>, vector<1x128xf32>
    %c40 = arith.constant 40 : index
    %c0_5 = arith.constant 0 : index
    %5 = vector.load %arg1[%c40, %c0_5] : memref<168x128xf32, #tpu.memory_space<vmem>>, vector<128x128xf32>
    %c0_6 = arith.constant 0 : index
    %c0_7 = arith.constant 0 : index
    %6 = vector.load %arg0[%c0_6, %c0_7] : memref<8x32xf32, #tpu.memory_space<vmem>>, vector<8x32xf32>
    %cst = arith.constant dense<0.000000e+00> : vector<8x128xf32>
    %7 = tpu.matmul %6, %0, %cst {dimension_numbers = #tpu.dot_dimension_numbers<[1], [0], [0], [1], [0, 0, 1, 1], [], []>} : vector<8x32xf32>, vector<32x128xf32>, vector<8x128xf32> -> vector<8x128xf32>
    %8 = vector.broadcast %1 : vector<1x128xf32> to vector<8x128xf32>
    %9 = arith.addf %7, %8 : vector<8x128xf32>
    %cst_8 = arith.constant dense<0.000000e+00> : vector<128xf32>
    %10 = vector.multi_reduction <add>, %9, %cst_8 [0] : vector<8x128xf32> to vector<128xf32>
    %11 = vector.shape_cast %10 : vector<128xf32> to vector<1x128xf32>
    %cst_9 = arith.constant 1.250000e-01 : f32
    %12 = vector.broadcast %cst_9 : f32 to vector<1x128xf32>
    %13 = arith.mulf %11, %12 : vector<1x128xf32>
    %14 = vector.broadcast %13 : vector<1x128xf32> to vector<8x128xf32>
    %15 = arith.subf %9, %14 : vector<8x128xf32>
    %16 = arith.mulf %15, %15 : vector<8x128xf32>
    %cst_10 = arith.constant dense<0.000000e+00> : vector<128xf32>
    %17 = vector.multi_reduction <add>, %16, %cst_10 [0] : vector<8x128xf32> to vector<128xf32>
    %18 = vector.shape_cast %17 : vector<128xf32> to vector<1x128xf32>
    %cst_11 = arith.constant 1.250000e-01 : f32
    %19 = vector.broadcast %cst_11 : f32 to vector<1x128xf32>
    %20 = arith.mulf %18, %19 : vector<1x128xf32>
    %cst_12 = arith.constant 9.99999974E-6 : f32
    %21 = vector.broadcast %cst_12 : f32 to vector<1x128xf32>
    %22 = arith.addf %20, %21 : vector<1x128xf32>
    %23 = math.rsqrt %22 : vector<1x128xf32>
    %24 = arith.mulf %2, %23 : vector<1x128xf32>
    %25 = arith.mulf %13, %24 : vector<1x128xf32>
    %26 = arith.subf %3, %25 : vector<1x128xf32>
    %27 = vector.broadcast %24 : vector<1x128xf32> to vector<8x128xf32>
    %28 = arith.mulf %9, %27 : vector<8x128xf32>
    %29 = vector.broadcast %26 : vector<1x128xf32> to vector<8x128xf32>
    %30 = arith.addf %28, %29 : vector<8x128xf32>
    %cst_13 = arith.constant 0.000000e+00 : f32
    %31 = vector.broadcast %cst_13 : f32 to vector<8x128xf32>
    %32 = arith.maximumf %30, %31 : vector<8x128xf32>
    %cst_14 = arith.constant dense<0.000000e+00> : vector<8x128xf32>
    %33 = tpu.matmul %32, %5, %cst_14 {dimension_numbers = #tpu.dot_dimension_numbers<[1], [0], [0], [1], [0, 0, 1, 1], [], []>} : vector<8x128xf32>, vector<128x128xf32>, vector<8x128xf32> -> vector<8x128xf32>
    %34 = vector.broadcast %4 : vector<1x128xf32> to vector<8x128xf32>
    %35 = arith.addf %33, %34 : vector<8x128xf32>
    %c0_15 = arith.constant 0 : index
    %c0_16 = arith.constant 0 : index
    %36 = vector.load %arg2[%c0_15, %c0_16] : memref<8x128xf32, #tpu.memory_space<vmem>>, vector<8x128xf32>
    tpu.vector_store %arg2[%c0_15, %c0_16], %35 {strides = array<i32>} : memref<8x128xf32, #tpu.memory_space<vmem>>, vector<8x128xf32>,
    return
  }
}

</mosaic_0001>

<bundles_post_ra>
// kernel: classifier_head.1
= control target key start
LH: loop header
LB: loop body
LE: loop exit
PB: predicated region body
PF: predicated region fallthrough
CT: control target
= control target key end

     0   :  { %7 = vsyncpa [#allocation3], 0  ;;  %s290_s0 = inlined_call_operand.hbm [shape: f32[8,32], index: 0, kind: input, shape index: {}]   ;;  %s291_s1 = inlined_call_operand.hbm [shape: f32[168,128], index: 1, kind: input, shape index: {}]   ;;  %s292_s2 = inlined_call_operand.hbm [shape: f32[8,128], index: 2, kind: output, shape index: {}]  }
   0x1   :  { %8 = vsyncpa [#allocation6], 0 }
   0x2   :  { %9 = vsyncpa [#allocation4], 0  ;;  %s15_s11 = sshll.u32 %s290_s0, 4  ;;  %s255_s12 = smov [#allocation2]   ;;  %s16_s11 = int_to_ptr.hbm [resolvable:$true] %s15_s11 }
   0x3   :  { %s17_s13 = sshll.u32 %s255_s12, 4  ;;  %s25_s16 = sshll.u32 %s291_s1, 4  ;;  %s18_s13 = int_to_ptr.vmem [resolvable:$true] %s17_s13  ;;  %s26_s16 = int_to_ptr.hbm [resolvable:$true] %s25_s16 }
   0x4   :  { %20 = dma.hbm_to_vmem [thread:$0]  %s16_s11, 128, %s18_s13, [#allocation3]  }
   0x5   :  { %s256_s17 = smov [#allocation5]   ;;  %s257_s19 = smov 128  }
   0x6   :  { %s27_s18 = sshll.u32 %s256_s17, 4  ;;  %s258_s20 = smov 8   ;;  %s28_s18 = int_to_ptr.vmem [resolvable:$true] %s27_s18 }
   0x7   :  { %33 = dma.hbm_to_vmem [thread:$0]  %s26_s16, 2688, %s28_s18, [#allocation6], %s257_s19, %s257_s19, %s258_s20  }
   0x8   :  { %249 = dma.done.wait [#allocation3], 128  }
   0x9   :  { %250 = vsyncadd [#allocation3], 4294967168 }
   0xa   :  { %251 = dma.done.wait [#allocation6], 2688  }
   0xb   :  { %252 = vsyncadd [#allocation6], 4294964608  ;;  %v45_v0 = vld [vmem:[#allocation5 + $0x18] sm:$0xff]  ;;  %v44_v1 = vld [vmem:[#allocation5 + $0x10] sm:$0xff]  ;;  %vm68_vm0 = vcmask 261120   ;;  %s259_s0 = smov [#allocation7]  }
   0xc   :  { %84 = vmatpush.msra.mxu0 %v45_v0  ;;  %v43_v2 = vld [vmem:[#allocation5 + $0x8] sm:$0xff]  ;;  %v42_v3 = vld [vmem:[#allocation5] sm:$0xff]  ;;  %v66_v4 = vld [vmem:[#allocation2] sm:$0xff]  ;;  %s154_s1 = sshll.u32 %s259_s0, 4  ;;  %s156_s23 = sshll.u32 %s292_s2, 4  ;;  %s155_s1 = int_to_ptr.vmem [resolvable:$true] %s154_s1  ;;  %s157_s23 = int_to_ptr.hbm [resolvable:$true] %s156_s23 }
   0xd   :  { %v173_v5 = vld [vmem:[#allocation5 + $0x20] ss:$0 sm:$0xff]  ;;  %v64_v11 = vld [vmem:[#allocation5 + $0x98] sm:$0xff]  ;;  %v63_v12 = vld [vmem:[#allocation5 + $0x90] sm:$0xff] }
   0xe   :  { %85 = vmatpush.msra.mxu0 %v44_v1  ;;  %v65_v9 = vld [vmem:[#allocation5 + $0xa0] sm:$0xff]  ;;  %v62_v14 = vld [vmem:[#allocation5 + $0x88] sm:$0xff]  ;;  %v60_v18 = vld [vmem:[#allocation5 + $0x78] sm:$0xff] }
   0xf   :  { %128 = vmatpush.msra.mxu1 %v65_v9  ;;  %v61_v16 = vld [vmem:[#allocation5 + $0x80] sm:$0xff]  ;;  %v59_v20 = vld [vmem:[#allocation5 + $0x70] sm:$0xff]  ;;  %v58_v22 = vld [vmem:[#allocation5 + $0x68] sm:$0xff] }
  0x10   :  { %86 = vmatpush.msra.mxu0 %v43_v2  ;;  %v57_v24 = vld [vmem:[#allocation5 + $0x60] sm:$0xff]  ;;  %v56_v26 = vld [vmem:[#allocation5 + $0x58] sm:$0xff]  ;;  %v55_v28 = vld [vmem:[#allocation5 + $0x50] sm:$0xff] }
  0x11   :  { %129 = vmatpush.msra.mxu1 %v64_v11  ;;  %v54_v30 = vld [vmem:[#allocation5 + $0x48] sm:$0xff]  ;;  %v53_v32 = vld [vmem:[#allocation5 + $0x40] sm:$0xff]  ;;  %v52_v34 = vld [vmem:[#allocation5 + $0x38] sm:$0xff] }
  0x12   :  { %87 = vmatpush.msra.mxu0 %v42_v3  ;;  %v51_v36 = vld [vmem:[#allocation5 + $0x30] sm:$0xff]  ;;  %v50_v38 = vld [vmem:[#allocation5 + $0x28] sm:$0xff]  ;;  %v47_v46 = vld [vmem:[#allocation5 + $0x21] sm:$0x1] }
  0x13   :  { %167 = vmatmul.msk.f32.vlgmr.msra.gmra.mxu0 %vm68_vm0, %v66_v4  ;;  %130 = vmatpush.msra.mxu1 %v63_v12  ;;  %v48_v50 = vld [vmem:[#allocation5 + $0x22] sm:$0x1]  ;;  %v174_v58 = vld [vmem:[#allocation5 + $0x23] ss:$0 sm:$0xff] }
  0x15   :  { %131 = vmatpush.msra.mxu1 %v62_v14 }
  0x17   :  { %132 = vmatpush.msra.mxu1 %v61_v16 }
  0x19   :  { %133 = vmatpush.msra.mxu1 %v60_v18 }
  0x1b   :  { %134 = vmatpush.msra.mxu1 %v59_v20 }
  0x1d   :  { %135 = vmatpush.msra.mxu1 %v58_v22 }
  0x1f   :  { %136 = vmatpush.msra.mxu1 %v57_v24 }
  0x21   :  { %137 = vmatpush.msra.mxu1 %v56_v26 }
  0x23   :  { %138 = vmatpush.msra.mxu1 %v55_v28 }
  0x25   :  { %139 = vmatpush.msra.mxu1 %v54_v30 }
  0x27   :  { %140 = vmatpush.msra.mxu1 %v53_v32 }
  0x29   :  { %141 = vmatpush.msra.mxu1 %v52_v34 }
  0x2b   :  { %142 = vmatpush.msra.mxu1 %v51_v36 }
  0x2d   :  { %143 = vmatpush.msra.mxu1 %v50_v38 }
  0x90   :  { %v89_v6 = vpop.f32.mrf.mxu0 }
  0x91   :  { %v281_v7 = vadd.f32 %v173_v5, %v89_v6 }
  0x93   :  { %v92_v8 = vrot.slane %v281_v7, 4 }
  0x95   :  { %v93_v10 = vadd.f32 %v92_v8, %v281_v7 }
  0x97   :  { %v94_v13 = vrot.slane %v93_v10, 2 }
  0x99   :  { %v95_v15 = vadd.f32 %v94_v13, %v93_v10 }
  0x9b   :  { %v96_v17 = vrot.slane %v95_v15, 1 }
  0x9d   :  { %v97_v19 = vadd.f32 %v96_v17, %v95_v15 }
  0x9f   :  { %v98_v21 = vmul.f32 0.125, %v97_v19 }
  0xa1   :  { %v99_v23 = vsub.f32 %v281_v7, %v98_v21 }
  0xa3   :  { %v100_v25 = vmul.f32 %v99_v23, %v99_v23 }
  0xa5   :  { %v101_v27 = vrot.slane %v100_v25, 4 }
  0xa7   :  { %v102_v29 = vadd.f32 %v101_v27, %v100_v25 }
  0xa9   :  { %v103_v31 = vrot.slane %v102_v29, 2 }
  0xab   :  { %v104_v33 = vadd.f32 %v103_v31, %v102_v29 }
  0xad   :  { %v105_v35 = vrot.slane %v104_v33, 1 }
  0xaf   :  { %v106_v37 = vadd.f32 %v105_v35, %v104_v33 }
  0xb1   :  { %v107_v39 = vmul.f32 0.125, %v106_v37 }
  0xb3   :  { %v108_v40 = vadd.f32 1e-05, %v107_v39 }
  0xb5   :  { %175 = vrsqrt.f32 %v108_v40  ;;  %vm115_vm2 = vweird.f32 %v108_v40 }
  0xbb   :  { %v176_v41 = vpop.eup %175 }
  0xbc   :  { %v110_v42 = vmul.f32 %v176_v41, %v108_v40  ;;  %vm116_vm1 = vweird.f32 %v176_v41 }
  0xbd   :  { %vm117_vm3 = vmor %vm115_vm2, %vm116_vm1 }
  0xbe   :  { %v111_v43 = vmul.f32 %v176_v41, %v110_v42 }
  0xc0   :  { %v112_v44 = vmul.f32 0.5, %v111_v43 }
  0xc2   :  { %v113_v45 = vsub.f32 1.5, %v112_v44 }
  0xc4   :  { %v114_v47 = vmul.f32 %v176_v41, %v113_v45 }
  0xc6   :  { %v118_v48 = vsel %vm117_vm3, %v176_v41, %v114_v47 }
  0xc7   :  { %v119_v49 = vmul.f32 %v118_v48, %v47_v46 }
  0xc9   :  { %v120_v51 = vmul.f32 %v119_v49, %v98_v21  ;;  %v122_v52 = vperm.slane %v119_v49, 0 }
  0xcb   :  { %v121_v53 = vsub.f32 %v48_v50, %v120_v51  ;;  %v123_v54 = vmul.f32 %v122_v52, %v281_v7 }
  0xcd   :  { %v124_v55 = vperm.slane %v121_v53, 0 }
  0xcf   :  { %v125_v56 = vadd.f32 %v124_v55, %v123_v54 }
  0xd1   :  { %v126_v57 = vmax.f32 %v125_v56, 0.0 }
  0xd3   :  { %144 = vmatmul.f32.vlgmr.msra.gmra.mxu1 %v126_v57 }
 0x150   :  { %v145_v59 = vpop.f32.mrf.mxu1 }
 0x151   :  { %v146_v60 = vadd.f32 %v174_v58, %v145_v59 }
 0x153   :  { %148 = vst [vmem:[#allocation7] sm:$0xff] %v146_v60 }
 0x154   :  { %159 = dma.vmem_to_hbm [thread:$0]  %s155_s1, 128, %s157_s23, [#allocation4]  }
 0x155   :  { %253 = dma.done.wait [#allocation4], 128  }
 0x156   :  { %254 = vsyncadd [#allocation4], 4294967168 }
 0x157   :  { %164 = vsyncpa [#allocation3], 1 }
 0x158   :  { %165 = vsyncpa [#allocation6], 1 }
 0x159   :  { %166 = vsyncpa [#allocation4], 1 }

</bundles_post_ra>
